<compile_context>
chip_gen: v6e
topology: v6e:2x2x1
jax: 0.10.0
libtpu: 0.0.40
codegen_flags: <defaults>
</compile_context>

<pallas_src>
import functools

import jax
import jax.numpy as jnp
from jax.experimental import pallas as pl
from jax.experimental.pallas import tpu as pltpu


def _round_up(x, m):
    return ((x + m - 1) // m) * m


def _pick_tile_max():
    # Bigger spatial tiles amortize the fixed halo read and the per-grid-step
    # overhead.  v5e/v6e have 128 MiB physical VMEM (room for 2048-wide
    # tiles); v7x only has 64 MiB, so stay at 1024 there.
    try:
        if pltpu.get_tpu_info().vmem_capacity_bytes >= 100 * 1024 * 1024:
            return 2048
    except Exception:
        pass
    return 1024


# ----------------------------- Pallas kernel --------------------------------
def _conv_kernel(x_hbm, w_ref, b_ref, o_ref, xbuf, col, sem, *,
                 cin, tile, win, nb, tap_offsets, use_activation):
    """One (batch, spatial-tile) block: fused im2col + single MXU matmul."""
    n = pl.program_id(0)        # batch element    ("parallel")
    ib = pl.program_id(1)       # spatial tile     ("arbitrary", sequential)
    slot = ib & 1

    def start_fetch(tile_idx, s):
        col0 = pl.multiple_of(tile_idx * tile, 128)
        pltpu.make_async_copy(
            x_hbm.at[pl.ds(n * cin, cin), pl.ds(col0, win)],
            xbuf.at[s], sem.at[s]).start()

    # Prime the pipeline on the first tile of this image.
    @pl.when(ib == 0)
    def _():
        start_fetch(ib, 0)

    # Prefetch the NEXT tile's slab before computing on the current one.
    @pl.when(ib + 1 < nb)
    def _():
        start_fetch(ib + 1, (ib + 1) & 1)

    # Wait for the current tile's slab (started last step, or by the prime).
    cur = pl.multiple_of(ib * tile, 128)
    pltpu.make_async_copy(
        x_hbm.at[pl.ds(n * cin, cin), pl.ds(cur, win)],
        xbuf.at[slot], sem.at[slot]).wait()

    # Fused im2col: one statically-offset slice per filter tap, written once
    # into the (KH*KW*Cin, tile) block (shifts happen here, only once).
    xslab = xbuf.at[slot]
    for t, off in enumerate(tap_offsets):
        col[pl.ds(t * cin, cin), :] = xslab[:, pl.ds(off, tile)]

    # Single MXU matmul with full contraction depth K = KH*KW*Cin, f32 acc.
    acc = jnp.dot(w_ref[...], col[...], preferred_element_type=jnp.float32)
    acc = acc + b_ref[...]                       # (Cout, 1) bias, f32
    if use_activation:
        acc = jnp.maximum(acc, 0.0)
    o_ref[...] = acc.astype(o_ref.dtype)         # lane-dense bf16 store


# ------------------------------- wrapper -------------------------------------
def basic_block_forward(x_nchw, weight, bias, stride, padding,
                        use_activation=True, tile_max=None,
                        out_dtype=jnp.bfloat16):
    """Matches torch BasicBlock.forward (Conv2d + bias [+ ReLU]); NCHW in/out.

    x_nchw : (N, Cin, H, W)
    weight : (Cout, Cin, KH, KW)   (torch Conv2d convention)
    bias   : (Cout,)
    """
    N, Cin, H, W = x_nchw.shape
    Cout, wcin, KH, KW = weight.shape
    assert wcin == Cin
    sh, sw = stride
    ph, pw = padding

    if tile_max is None:
        tile_max = _pick_tile_max()
    assert tile_max % 128 == 0, "tile_max must be a multiple of 128"

    Hp, Wp = H + 2 * ph, W + 2 * pw
    OH = (Hp - KH) // sh + 1
    OW = (Wp - KW) // sw + 1

    # Dense (stride-1) output positions per image, tiled along the lane axis.
    M = Hp * Wp
    tile = min(tile_max, _round_up(M, 128))      # multiple of 128 by construction
    nb = -(-M // tile)
    halo = (KH - 1) * Wp + (KW - 1)
    win = tile + _round_up(halo, 128)            # slab width incl. halo
    need = (nb - 1) * tile + win                 # flat length the last window needs

    # Single padding pass (fused with the bf16 cast): spatial zero-pad plus
    # extra bottom rows so the flattened row-major spatial axis already covers
    # every tile's (tile + halo) window.
    extra_flat = max(0, need - Hp * Wp)
    extra_rows = -(-extra_flat // Wp)
    xpad = jnp.pad(x_nchw.astype(jnp.bfloat16),
                   ((0, 0), (0, 0), (ph, ph + extra_rows), (pw, pw)))
    L = (Hp + extra_rows) * Wp
    x2d = xpad.reshape(N * Cin, L)               # contiguous reshape (free)

    # (Cout, Cin, KH, KW) -> (Cout, KH*KW*Cin): one fused im2col weight matrix.
    kdim = KH * KW * Cin
    w2d = jnp.transpose(weight, (0, 2, 3, 1)).reshape(Cout, kdim)
    w2d = w2d.astype(jnp.bfloat16)
    bias2d = bias.reshape(Cout, 1).astype(jnp.float32)

    tap_offsets = tuple(ki * Wp + kj for ki in range(KH) for kj in range(KW))

    kernel = functools.partial(
        _conv_kernel, cin=Cin, tile=tile, win=win, nb=nb,
        tap_offsets=tap_offsets, use_activation=use_activation)

    # Explicit VMEM budget: double-buffered slab + im2col block + (Pallas
    # double-buffered) weights/output blocks + live f32 accumulator.
    vmem_needed = (2 * Cin * win * 2 + kdim * tile * 2 + 2 * Cout * kdim * 2
                   + 2 * Cout * tile * 2 + Cout * tile * 4 + 2 * Cout * 4)
    vmem_limit = int(min(64 * 1024 * 1024,
                         max(16 * 1024 * 1024, 2 * vmem_needed)))

    dense = pl.pallas_call(
        kernel,
        out_shape=jax.ShapeDtypeStruct((N, Cout, nb * tile), out_dtype),
        grid_spec=pltpu.PrefetchScalarGridSpec(
            num_scalar_prefetch=0,
            grid=(N, nb),
            in_specs=[
                pl.BlockSpec(memory_space=pl.ANY),                 # manual DMA
                pl.BlockSpec((Cout, kdim), lambda n, i: (0, 0)),   # resident
                pl.BlockSpec((Cout, 1), lambda n, i: (0, 0)),      # resident
            ],
            out_specs=pl.BlockSpec((None, Cout, tile), lambda n, i: (n, 0, i)),
            scratch_shapes=[
                pltpu.VMEM((2, Cin, win), jnp.bfloat16),   # double-buffered slab
                pltpu.VMEM((kdim, tile), jnp.bfloat16),    # fused im2col block
                pltpu.SemaphoreType.DMA((2,)),
            ]),
        compiler_params=pltpu.CompilerParams(
            # Spatial-tile axis carries cross-step DMA prefetch state, so it
            # must run sequentially per core; batch axis is megacore-parallel.
            dimension_semantics=("parallel", "arbitrary"),
            vmem_limit_bytes=vmem_limit),
    )(x2d, w2d, bias2d)

    # Crop the dense stride-1 result back to the valid, strided output (NCHW).
    # Border positions beyond (OH, OW) read wrapped / zero-padded rows and are
    # garbage by design; this crop is what makes the result correct.
    dense = dense[:, :, :M].reshape(N, Cout, Hp, Wp)
    return dense[:, :, ::sh, ::sw][:, :, :OH, :OW]


# --------------------------------- main --------------------------------------
if __name__ == "__main__":
    key = jax.random.PRNGKey(0)
    k_x, k_w, k_b = jax.random.split(key, 3)

    # BasicBlock config: Conv2d(16 -> 32, kernel (3,3), stride (1,1), pad (1,1)) + ReLU
    N, Cin, H, W = 2, 16, 16, 16
    Cout, KH, KW = 32, 3, 3
    stride, padding = (1, 1), (1, 1)

    x = jax.random.normal(k_x, (N, Cin, H, W), dtype=jnp.float32)
    fan_in = Cin * KH * KW
    bound = 1.0 / (fan_in ** 0.5)                 # torch default init bound
    weight = jax.random.uniform(k_w, (Cout, Cin, KH, KW), jnp.float32,
                                minval=-bound, maxval=bound)
    bias = jax.random.uniform(k_b, (Cout,), jnp.float32,
                              minval=-bound, maxval=bound)

    out = basic_block_forward(x, weight, bias, stride, padding,
                              use_activation=True)
    out = jax.block_until_ready(out)

    # Reference: XLA conv on the same bf16-rounded operands (the kernel uses
    # bf16 operands, f32 accumulation and a bf16 output).
    xb = x.astype(jnp.bfloat16).astype(jnp.float32)
    wb = weight.astype(jnp.bfloat16).astype(jnp.float32)
    ref = jax.lax.conv_general_dilated(
        xb, wb, window_strides=stride,
        padding=[(padding[0], padding[0]), (padding[1], padding[1])],
        dimension_numbers=("NCHW", "OIHW", "NCHW"))
    ref = jnp.maximum(ref + bias.reshape(1, Cout, 1, 1), 0.0)

    assert out.shape == (N, Cout, H, W), out.shape
    assert out.dtype == jnp.bfloat16, out.dtype
    out_f32 = out.astype(jnp.float32)
    err = float(jnp.max(jnp.abs(out_f32 - ref)))
    assert jnp.allclose(out_f32, ref, atol=2e-2, rtol=2e-2), (
        f"mismatch vs reference, max abs err = {err}")

    print("KERNEL_OK")
</pallas_src>

<mosaic_0001>
module attributes {stable_mosaic.version = 11 : i64} {
  func.func @_conv_kernel(%arg0: i32, %arg1: i32, %arg2: memref<32x522xbf16, #tpu.memory_space<any>>, %arg3: memref<32x144xbf16, #tpu.memory_space<vmem>>, %arg4: memref<32x1xf32, #tpu.memory_space<vmem>>, %arg5: memref<1x32x384xbf16, #tpu.memory_space<vmem>>, %arg6: memref<2x16x512xbf16, #tpu.memory_space<vmem>>, %arg7: memref<144x384xbf16, #tpu.memory_space<vmem>>, %arg8: memref<2x!tpu.dma_semaphore, #tpu.memory_space<semaphore_mem>>) attributes {dimension_semantics = [#tpu.dimension_semantics<parallel>, #tpu.dimension_semantics<arbitrary>], iteration_bounds = array<i64: 2, 1>, scalar_prefetch = 0 : i64, scratch_operands = 3 : i64, tpu.core_type = #tpu.core_type<tc>, window_params = [{}, {pipeline_mode = #tpu.pipeline_mode<synchronous>, transform_indices = @transform_1, window_bounds = array<i64: 32, 144>}, {pipeline_mode = #tpu.pipeline_mode<synchronous>, transform_indices = @transform_2, window_bounds = array<i64: 32, 1>}, {transform_indices = @transform_3, window_bounds = array<i64: 1, 32, 384>}]} {
    %c1_i32 = arith.constant 1 : i32
    %0 = arith.andi %arg1, %c1_i32 : i32
    %c0_i32 = arith.constant 0 : i32
    %1 = arith.cmpi eq, %arg1, %c0_i32 : i32
    %2 = arith.extui %1 : i1 to i32
    %c0_i32_0 = arith.constant 0 : i32
    %3 = arith.cmpi ne, %2, %c0_i32_0 : i32
    scf.if %3 {
      %c384_i32_53 = arith.constant 384 : i32
      %64 = arith.muli %arg1, %c384_i32_53 : i32
      %65 = tpu.assume_multiple %64, 128 : i32
      %c16_i32_54 = arith.constant 16 : i32
      %66 = arith.muli %arg0, %c16_i32_54 : i32
      %c0_i32_55 = arith.constant 0 : i32
      %c0_i32_56 = arith.constant 0 : i32
      %67 = tpu.memref_slice %arg2[%66, %65] : memref<32x522xbf16, #tpu.memory_space<any>> -> memref<16x512xbf16, #tpu.memory_space<any>>
      %c0_i32_57 = arith.constant 0 : i32
      %c0_i32_58 = arith.constant 0 : i32
      %68 = tpu.memref_slice %arg6[%c0_i32_55, %c0_i32_57, %c0_i32_58] : memref<2x16x512xbf16, #tpu.memory_space<vmem>> -> memref<1x16x512xbf16, #tpu.memory_space<vmem>>
      %69 = tpu.memref_squeeze %68 : memref<1x16x512xbf16, #tpu.memory_space<vmem>> -> memref<16x512xbf16, #tpu.memory_space<vmem>>
      %70 = tpu.memref_slice %arg8[%c0_i32_56] : memref<2x!tpu.dma_semaphore, #tpu.memory_space<semaphore_mem>> -> memref<1x!tpu.dma_semaphore, #tpu.memory_space<semaphore_mem>>
      %71 = tpu.memref_squeeze %70 : memref<1x!tpu.dma_semaphore, #tpu.memory_space<semaphore_mem>> -> memref<!tpu.dma_semaphore, #tpu.memory_space<semaphore_mem>>
      tpu.enqueue_dma source(%67 : memref<16x512xbf16, #tpu.memory_space<any>>) target(%69 : memref<16x512xbf16, #tpu.memory_space<vmem>>) target_semaphore(%71 : memref<!tpu.dma_semaphore, #tpu.memory_space<semaphore_mem>>)
    } else {
    }
    %c1_i32_1 = arith.constant 1 : i32
    %4 = arith.addi %arg1, %c1_i32_1 : i32
    %c1_i32_2 = arith.constant 1 : i32
    %5 = arith.cmpi slt, %4, %c1_i32_2 : i32
    %6 = arith.extui %5 : i1 to i32
    %c0_i32_3 = arith.constant 0 : i32
    %7 = arith.cmpi ne, %6, %c0_i32_3 : i32
    scf.if %7 {
      %c1_i32_53 = arith.constant 1 : i32
      %64 = arith.addi %arg1, %c1_i32_53 : i32
      %c1_i32_54 = arith.constant 1 : i32
      %65 = arith.addi %arg1, %c1_i32_54 : i32
      %c1_i32_55 = arith.constant 1 : i32
      %66 = arith.andi %65, %c1_i32_55 : i32
      %c384_i32_56 = arith.constant 384 : i32
      %67 = arith.muli %64, %c384_i32_56 : i32
      %68 = tpu.assume_multiple %67, 128 : i32
      %c16_i32_57 = arith.constant 16 : i32
      %69 = arith.muli %arg0, %c16_i32_57 : i32
      %70 = tpu.memref_slice %arg2[%69, %68] : memref<32x522xbf16, #tpu.memory_space<any>> -> memref<16x512xbf16, #tpu.memory_space<any>>
      %c0_i32_58 = arith.constant 0 : i32
      %c0_i32_59 = arith.constant 0 : i32
      %71 = tpu.memref_slice %arg6[%66, %c0_i32_58, %c0_i32_59] : memref<2x16x512xbf16, #tpu.memory_space<vmem>> -> memref<1x16x512xbf16, #tpu.memory_space<vmem>>
      %72 = tpu.memref_squeeze %71 : memref<1x16x512xbf16, #tpu.memory_space<vmem>> -> memref<16x512xbf16, #tpu.memory_space<vmem>>
      %73 = tpu.memref_slice %arg8[%66] : memref<2x!tpu.dma_semaphore, #tpu.memory_space<semaphore_mem>> -> memref<1x!tpu.dma_semaphore, #tpu.memory_space<semaphore_mem>>
      %74 = tpu.memref_squeeze %73 : memref<1x!tpu.dma_semaphore, #tpu.memory_space<semaphore_mem>> -> memref<!tpu.dma_semaphore, #tpu.memory_space<semaphore_mem>>
      tpu.enqueue_dma source(%70 : memref<16x512xbf16, #tpu.memory_space<any>>) target(%72 : memref<16x512xbf16, #tpu.memory_space<vmem>>) target_semaphore(%74 : memref<!tpu.dma_semaphore, #tpu.memory_space<semaphore_mem>>)
    } else {
    }
    %c384_i32 = arith.constant 384 : i32
    %8 = arith.muli %arg1, %c384_i32 : i32
    %9 = tpu.assume_multiple %8, 128 : i32
    %c16_i32 = arith.constant 16 : i32
    %10 = arith.muli %arg0, %c16_i32 : i32
    %11 = tpu.memref_slice %arg2[%10, %9] : memref<32x522xbf16, #tpu.memory_space<any>> -> memref<16x512xbf16, #tpu.memory_space<any>>
    %c0_i32_4 = arith.constant 0 : i32
    %c0_i32_5 = arith.constant 0 : i32
    %12 = tpu.memref_slice %arg6[%0, %c0_i32_4, %c0_i32_5] : memref<2x16x512xbf16, #tpu.memory_space<vmem>> -> memref<1x16x512xbf16, #tpu.memory_space<vmem>>
    %13 = tpu.memref_squeeze %12 : memref<1x16x512xbf16, #tpu.memory_space<vmem>> -> memref<16x512xbf16, #tpu.memory_space<vmem>>
    %14 = tpu.memref_slice %arg8[%0] : memref<2x!tpu.dma_semaphore, #tpu.memory_space<semaphore_mem>> -> memref<1x!tpu.dma_semaphore, #tpu.memory_space<semaphore_mem>>
    %15 = tpu.memref_squeeze %14 : memref<1x!tpu.dma_semaphore, #tpu.memory_space<semaphore_mem>> -> memref<!tpu.dma_semaphore, #tpu.memory_space<semaphore_mem>>
    tpu.wait_dma2 semaphore(%15 : memref<!tpu.dma_semaphore, #tpu.memory_space<semaphore_mem>>) src(%11 : memref<16x512xbf16, #tpu.memory_space<any>>) dst(%13 : memref<16x512xbf16, #tpu.memory_space<vmem>>)
    %c0_i32_6 = arith.constant 0 : i32
    %c0_i32_7 = arith.constant 0 : i32
    %16 = tpu.memref_slice %arg6[%0, %c0_i32_6, %c0_i32_7] : memref<2x16x512xbf16, #tpu.memory_space<vmem>> -> memref<1x16x512xbf16, #tpu.memory_space<vmem>>
    %17 = tpu.memref_squeeze %16 : memref<1x16x512xbf16, #tpu.memory_space<vmem>> -> memref<16x512xbf16, #tpu.memory_space<vmem>>
    %c0 = arith.constant 0 : index
    %c0_8 = arith.constant 0 : index
    %18 = vector.load %17[%c0, %c0_8] : memref<16x512xbf16, #tpu.memory_space<vmem>>, vector<16x384xbf16>
    %c0_9 = arith.constant 0 : index
    %c0_10 = arith.constant 0 : index
    %19 = vector.load %arg7[%c0_9, %c0_10] : memref<144x384xbf16, #tpu.memory_space<vmem>>, vector<16x384xbf16>
    tpu.vector_store %arg7[%c0_9, %c0_10], %18 {strides = array<i32>} : memref<144x384xbf16, #tpu.memory_space<vmem>>, vector<16x384xbf16>,
    %c0_i32_11 = arith.constant 0 : i32
    %c0_i32_12 = arith.constant 0 : i32
    %20 = tpu.memref_slice %arg6[%0, %c0_i32_11, %c0_i32_12] : memref<2x16x512xbf16, #tpu.memory_space<vmem>> -> memref<1x16x512xbf16, #tpu.memory_space<vmem>>
    %21 = tpu.memref_squeeze %20 : memref<1x16x512xbf16, #tpu.memory_space<vmem>> -> memref<16x512xbf16, #tpu.memory_space<vmem>>
    %c0_13 = arith.constant 0 : index
    %c1 = arith.constant 1 : index
    %22 = vector.load %21[%c0_13, %c1] : memref<16x512xbf16, #tpu.memory_space<vmem>>, vector<16x384xbf16>
    %c16 = arith.constant 16 : index
    %c0_14 = arith.constant 0 : index
    %23 = vector.load %arg7[%c16, %c0_14] : memref<144x384xbf16, #tpu.memory_space<vmem>>, vector<16x384xbf16>
    tpu.vector_store %arg7[%c16, %c0_14], %22 {strides = array<i32>} : memref<144x384xbf16, #tpu.memory_space<vmem>>, vector<16x384xbf16>,
    %c0_i32_15 = arith.constant 0 : i32
    %c0_i32_16 = arith.constant 0 : i32
    %24 = tpu.memref_slice %arg6[%0, %c0_i32_15, %c0_i32_16] : memref<2x16x512xbf16, #tpu.memory_space<vmem>> -> memref<1x16x512xbf16, #tpu.memory_space<vmem>>
    %25 = tpu.memref_squeeze %24 : memref<1x16x512xbf16, #tpu.memory_space<vmem>> -> memref<16x512xbf16, #tpu.memory_space<vmem>>
    %c0_17 = arith.constant 0 : index
    %c2 = arith.constant 2 : index
    %26 = vector.load %25[%c0_17, %c2] : memref<16x512xbf16, #tpu.memory_space<vmem>>, vector<16x384xbf16>
    %c32 = arith.constant 32 : index
    %c0_18 = arith.constant 0 : index
    %27 = vector.load %arg7[%c32, %c0_18] : memref<144x384xbf16, #tpu.memory_space<vmem>>, vector<16x384xbf16>
    tpu.vector_store %arg7[%c32, %c0_18], %26 {strides = array<i32>} : memref<144x384xbf16, #tpu.memory_space<vmem>>, vector<16x384xbf16>,
    %c0_i32_19 = arith.constant 0 : i32
    %c0_i32_20 = arith.constant 0 : i32
    %28 = tpu.memref_slice %arg6[%0, %c0_i32_19, %c0_i32_20] : memref<2x16x512xbf16, #tpu.memory_space<vmem>> -> memref<1x16x512xbf16, #tpu.memory_space<vmem>>
    %29 = tpu.memref_squeeze %28 : memref<1x16x512xbf16, #tpu.memory_space<vmem>> -> memref<16x512xbf16, #tpu.memory_space<vmem>>
    %c0_21 = arith.constant 0 : index
    %c18 = arith.constant 18 : index
    %30 = vector.load %29[%c0_21, %c18] : memref<16x512xbf16, #tpu.memory_space<vmem>>, vector<16x384xbf16>
    %c48 = arith.constant 48 : index
    %c0_22 = arith.constant 0 : index
    %31 = vector.load %arg7[%c48, %c0_22] : memref<144x384xbf16, #tpu.memory_space<vmem>>, vector<16x384xbf16>
    tpu.vector_store %arg7[%c48, %c0_22], %30 {strides = array<i32>} : memref<144x384xbf16, #tpu.memory_space<vmem>>, vector<16x384xbf16>,
    %c0_i32_23 = arith.constant 0 : i32
    %c0_i32_24 = arith.constant 0 : i32
    %32 = tpu.memref_slice %arg6[%0, %c0_i32_23, %c0_i32_24] : memref<2x16x512xbf16, #tpu.memory_space<vmem>> -> memref<1x16x512xbf16, #tpu.memory_space<vmem>>
    %33 = tpu.memref_squeeze %32 : memref<1x16x512xbf16, #tpu.memory_space<vmem>> -> memref<16x512xbf16, #tpu.memory_space<vmem>>
    %c0_25 = arith.constant 0 : index
    %c19 = arith.constant 19 : index
    %34 = vector.load %33[%c0_25, %c19] : memref<16x512xbf16, #tpu.memory_space<vmem>>, vector<16x384xbf16>
    %c64 = arith.constant 64 : index
    %c0_26 = arith.constant 0 : index
    %35 = vector.load %arg7[%c64, %c0_26] : memref<144x384xbf16, #tpu.memory_space<vmem>>, vector<16x384xbf16>
    tpu.vector_store %arg7[%c64, %c0_26], %34 {strides = array<i32>} : memref<144x384xbf16, #tpu.memory_space<vmem>>, vector<16x384xbf16>,
    %c0_i32_27 = arith.constant 0 : i32
    %c0_i32_28 = arith.constant 0 : i32
    %36 = tpu.memref_slice %arg6[%0, %c0_i32_27, %c0_i32_28] : memref<2x16x512xbf16, #tpu.memory_space<vmem>> -> memref<1x16x512xbf16, #tpu.memory_space<vmem>>
    %37 = tpu.memref_squeeze %36 : memref<1x16x512xbf16, #tpu.memory_space<vmem>> -> memref<16x512xbf16, #tpu.memory_space<vmem>>
    %c0_29 = arith.constant 0 : index
    %c20 = arith.constant 20 : index
    %38 = vector.load %37[%c0_29, %c20] : memref<16x512xbf16, #tpu.memory_space<vmem>>, vector<16x384xbf16>
    %c80 = arith.constant 80 : index
    %c0_30 = arith.constant 0 : index
    %39 = vector.load %arg7[%c80, %c0_30] : memref<144x384xbf16, #tpu.memory_space<vmem>>, vector<16x384xbf16>
    tpu.vector_store %arg7[%c80, %c0_30], %38 {strides = array<i32>} : memref<144x384xbf16, #tpu.memory_space<vmem>>, vector<16x384xbf16>,
    %c0_i32_31 = arith.constant 0 : i32
    %c0_i32_32 = arith.constant 0 : i32
    %40 = tpu.memref_slice %arg6[%0, %c0_i32_31, %c0_i32_32] : memref<2x16x512xbf16, #tpu.memory_space<vmem>> -> memref<1x16x512xbf16, #tpu.memory_space<vmem>>
    %41 = tpu.memref_squeeze %40 : memref<1x16x512xbf16, #tpu.memory_space<vmem>> -> memref<16x512xbf16, #tpu.memory_space<vmem>>
    %c0_33 = arith.constant 0 : index
    %c36 = arith.constant 36 : index
    %42 = vector.load %41[%c0_33, %c36] : memref<16x512xbf16, #tpu.memory_space<vmem>>, vector<16x384xbf16>
    %c96 = arith.constant 96 : index
    %c0_34 = arith.constant 0 : index
    %43 = vector.load %arg7[%c96, %c0_34] : memref<144x384xbf16, #tpu.memory_space<vmem>>, vector<16x384xbf16>
    tpu.vector_store %arg7[%c96, %c0_34], %42 {strides = array<i32>} : memref<144x384xbf16, #tpu.memory_space<vmem>>, vector<16x384xbf16>,
    %c0_i32_35 = arith.constant 0 : i32
    %c0_i32_36 = arith.constant 0 : i32
    %44 = tpu.memref_slice %arg6[%0, %c0_i32_35, %c0_i32_36] : memref<2x16x512xbf16, #tpu.memory_space<vmem>> -> memref<1x16x512xbf16, #tpu.memory_space<vmem>>
    %45 = tpu.memref_squeeze %44 : memref<1x16x512xbf16, #tpu.memory_space<vmem>> -> memref<16x512xbf16, #tpu.memory_space<vmem>>
    %c0_37 = arith.constant 0 : index
    %c37 = arith.constant 37 : index
    %46 = vector.load %45[%c0_37, %c37] : memref<16x512xbf16, #tpu.memory_space<vmem>>, vector<16x384xbf16>
    %c112 = arith.constant 112 : index
    %c0_38 = arith.constant 0 : index
    %47 = vector.load %arg7[%c112, %c0_38] : memref<144x384xbf16, #tpu.memory_space<vmem>>, vector<16x384xbf16>
    tpu.vector_store %arg7[%c112, %c0_38], %46 {strides = array<i32>} : memref<144x384xbf16, #tpu.memory_space<vmem>>, vector<16x384xbf16>,
    %c0_i32_39 = arith.constant 0 : i32
    %c0_i32_40 = arith.constant 0 : i32
    %48 = tpu.memref_slice %arg6[%0, %c0_i32_39, %c0_i32_40] : memref<2x16x512xbf16, #tpu.memory_space<vmem>> -> memref<1x16x512xbf16, #tpu.memory_space<vmem>>
    %49 = tpu.memref_squeeze %48 : memref<1x16x512xbf16, #tpu.memory_space<vmem>> -> memref<16x512xbf16, #tpu.memory_space<vmem>>
    %c0_41 = arith.constant 0 : index
    %c38 = arith.constant 38 : index
    %50 = vector.load %49[%c0_41, %c38] : memref<16x512xbf16, #tpu.memory_space<vmem>>, vector<16x384xbf16>
    %c128 = arith.constant 128 : index
    %c0_42 = arith.constant 0 : index
    %51 = vector.load %arg7[%c128, %c0_42] : memref<144x384xbf16, #tpu.memory_space<vmem>>, vector<16x384xbf16>
    tpu.vector_store %arg7[%c128, %c0_42], %50 {strides = array<i32>} : memref<144x384xbf16, #tpu.memory_space<vmem>>, vector<16x384xbf16>,
    %c0_43 = arith.constant 0 : index
    %c0_44 = arith.constant 0 : index
    %52 = vector.load %arg3[%c0_43, %c0_44] : memref<32x144xbf16, #tpu.memory_space<vmem>>, vector<32x144xbf16>
    %c0_45 = arith.constant 0 : index
    %c0_46 = arith.constant 0 : index
    %53 = vector.load %arg7[%c0_45, %c0_46] : memref<144x384xbf16, #tpu.memory_space<vmem>>, vector<144x384xbf16>
    %cst = arith.constant dense<0.000000e+00> : vector<32x384xf32>
    %54 = tpu.matmul %52, %53, %cst {dimension_numbers = #tpu.dot_dimension_numbers<[1], [0], [0], [1], [0, 0, 1, 1], [], []>} : vector<32x144xbf16>, vector<144x384xbf16>, vector<32x384xf32> -> vector<32x384xf32>
    %c0_47 = arith.constant 0 : index
    %c0_48 = arith.constant 0 : index
    %55 = vector.load %arg4[%c0_47, %c0_48] : memref<32x1xf32, #tpu.memory_space<vmem>>, vector<32x1xf32>
    %56 = vector.broadcast %55 : vector<32x1xf32> to vector<32x384xf32>
    %57 = arith.addf %54, %56 : vector<32x384xf32>
    %cst_49 = arith.constant 0.000000e+00 : f32
    %58 = vector.broadcast %cst_49 : f32 to vector<32x384xf32>
    %59 = arith.maximumf %57, %58 : vector<32x384xf32>
    %60 = arith.truncf %59 : vector<32x384xf32> to vector<32x384xbf16>
    %c0_50 = arith.constant 0 : index
    %c0_51 = arith.constant 0 : index
    %c0_52 = arith.constant 0 : index
    %61 = vector.load %arg5[%c0_50, %c0_51, %c0_52] : memref<1x32x384xbf16, #tpu.memory_space<vmem>>, vector<1x32x384xbf16>
    %62 = vector.shape_cast %61 : vector<1x32x384xbf16> to vector<32x384xbf16>
    %63 = vector.shape_cast %60 : vector<32x384xbf16> to vector<1x32x384xbf16>
    tpu.vector_store %arg5[%c0_50, %c0_51, %c0_52], %63 {strides = array<i32>} : memref<1x32x384xbf16, #tpu.memory_space<vmem>>, vector<1x32x384xbf16>,
    return
  }
  func.func @transform_1(%arg0: i32, %arg1: i32) -> (i32, i32) {
    %c0_i32 = arith.constant 0 : i32
    %c0_i32_0 = arith.constant 0 : i32
    %c0_i32_1 = arith.constant 0 : i32
    return %c0_i32, %c0_i32_0 : i32, i32
  }
  func.func @transform_2(%arg0: i32, %arg1: i32) -> (i32, i32) {
    %c0_i32 = arith.constant 0 : i32
    %c0_i32_0 = arith.constant 0 : i32
    %c0_i32_1 = arith.constant 0 : i32
    return %c0_i32, %c0_i32_0 : i32, i32
  }
  func.func @transform_3(%arg0: i32, %arg1: i32) -> (i32, i32, i32) {
    %c0_i32 = arith.constant 0 : i32
    %c0_i32_0 = arith.constant 0 : i32
    return %arg0, %c0_i32, %arg1 : i32, i32, i32
  }
}

</mosaic_0001>

<bundles_post_ra>
// kernel: tpu_custom_call.1
= control target key start
LH: loop header
LB: loop body
LE: loop exit
PB: predicated region body
PF: predicated region fallthrough
CT: control target
= control target key end

     0   :  { %8 = vsyncpa [#allocation6], 0  ;;  %s1527_s0 = inlined_call_operand.hbm [shape: bf16[32,522], index: 0, kind: input, shape index: {}]   ;;  %s1528_s1 = inlined_call_operand.vmem [shape: bf16[32,144], index: 1, kind: input, shape index: {}]   ;;  %s1529_s2 = inlined_call_operand.vmem [shape: f32[32,1], index: 2, kind: input, shape index: {}]   ;;  %s1530_s3 = inlined_call_operand.hbm [shape: bf16[2,32,384], index: 3, kind: output, shape index: {}]  }
   0x1   :  { %10 = vsyncpa [#allocation6 + $0x1], 0  ;;  %s1277_s12 = smov 0   ;;  %s1279_s13 = smov 0  }
   0x2   :  { %s1281_s14 = smov 0   ;;  %s1283_s15 = smov 0  }
   0x3   :  { %s1285_s16 = smov 0   ;;  %s1287_s17 = smov 0  }
   0x4 LB: > { %s981_s18 = sadd.s32 4294967295, %s1239_s17   ;;  %s982_s19 = sadd.s32 4294967294, %s1239_s17   ;;  %s1239_s17 = sphi %s1287_s17, %s16_s17   ;;  %s1235_s16 = sphi %s1285_s16, %s1537_s16   ;;  %s1231_s15 = sphi %s1283_s15, %s1536_s15   ;;  %s1227_s14 = sphi %s1281_s14, %s1535_s14   ;;  %s1223_s13 = sphi %s1279_s13, %s1534_s13   ;;  %s1219_s12 = sphi %s1277_s12, %s1533_s12  }
   0x5   : > { %s28_s20 = sadd.s32 1, %s1235_s16  ;;  %s79_s21 = sadd.s32 1, %s1227_s14 }
   0x6   : > { %p30_p0 = scmp.ge.s32.totalorder %s28_s20, 2  ;;  %p89_p1 = scmp.ne.s32.totalorder %s1227_s14, %s1223_s13 }
   0x7   : > { %p90_p2 = scmp.eq.s32.totalorder %s981_s18, 1  ;;  %p95_p3 = scmp.ne.s32.totalorder %s1223_s13, %s1219_s12 }
   0x8   : > { %s1539_s20 = smov (%p30_p0, %s28_s20), 0  ;;  %p96_p5 = scmp.eq.s32.totalorder %s982_s19, 1 }
   0x9   : > { %p1317_p4 = por %p90_p2, %p89_p1  ;;  %s74_s23 = ssub.s32 %s1235_s16, %s1539_s20 }
   0xa   : > { %p984_p6 = scmp.ge.s32.totalorder %s1239_s17, 1  ;;  %p77_p7 = scmp.eq.s32.totalorder %s74_s23, 0 }
   0xb   : > { %p1324_p8 = por %p96_p5, %p95_p3  ;;  %p120_p9 = scmp.lt.s32.totalorder %s1239_s17, 3 }
   0xc   : > { %s1330_s25 = scalar_select %p77_p7, %s1227_s14, %s79_s21  }
   0xd   : > { %p121_p10 = pnand %p984_p6, %p120_p9 }
   0xe   : > { %s134_s26 = sand.u32 (!%p121_p10), 1, %s1223_s13   ;;  %s985_s27 = sshll.u32 (!%p121_p10), %s1231_s15, 4 }
   0xf   : > { %124 = sbr.rel (%p121_p10) target bundleno = 456 (0x1c8), region = 28  ;;  %s148_s29 = sshra.s32 (!%p121_p10), %s985_s27, 3 }
  0x10   : > { %s1336_s28 = smul.u32 (!%p121_p10), 48, %s134_s26  ;;  %s1241_s4 = smov (!%p121_p10), [#allocation2]  }
  0x11   : > { %s1037_s30 = smul.u32 (!%p121_p10), 320, %s148_s29  ;;  %s155_s5 = sshll.u32 (!%p121_p10), %s1241_s4, 4  ;;  %s156_s5 = int_to_ptr.vmem [resolvable:$true] %s155_s5 }
  0x12   : > { %s1141_s18 = scalar_lea.hbm (!%p121_p10), %s1527_s0, 1280 }
  0x13   : > { %s153_s8 = scalar_lea.hbm (!%p121_p10), %s1527_s0, %s1037_s30 }
  0x14   : > { %s1139_s9 = scalar_lea.hbm %s153_s8, 512  ;;  %p1142_p12 = scmp.lt.s32.totalorder %s153_s8, %s1527_s0 }
  0x15   : > { %p1140_p11 = scmp.ne.s32.totalorder %s153_s8, %s1139_s9  ;;  %p1143_p13 = scmp.lt.s32.totalorder %s1141_s18, %s1139_s9 }
  0x17   : > { %p1144_p0 = por %p1143_p13, %p1142_p12 }
  0x19   : > { %p1145_p1 = pnand %p1144_p0, %p1140_p11 }
  0x1b   : > { %1148 = shalt.err (!%p1145_p1)  }
  0x1c   : > { %s1149_s23 = scalar_lea.vmem %s156_s5, 512  ;;  %s1153_s27 = scalar_lea.vmem %s156_s5, 1024 }
  0x1d   : > { %p1150_p2 = scmp.ne.s32.totalorder %s156_s5, %s1149_s23  ;;  %p1154_p3 = scmp.lt.s32.totalorder %s156_s5, %s156_s5 }
  0x1e   : > { %p1155_p5 = scmp.lt.s32.totalorder %s1153_s27, %s1149_s23 }
  0x20   : > { %p1156_p6 = por %p1155_p5, %p1154_p3 }
  0x22   : > { %p1157_p7 = pnand %p1156_p6, %p1150_p2 }
  0x24   : > { %1160 = shalt.err (!%p1157_p7)  }
  0x25   : > { %s1242_s29 = smov 320   ;;  %s1243_s30 = smov 256  }
  0x26   : > { %s1244_s4 = smov 16   ;;  %s1348_s6 = scalar_lea.vmem [#allocation5], %s1336_s28 }
  0x27   : > { %158 = dma.hbm_to_vmem [thread:$0]  %s153_s8, 512, %s156_s5, [#allocation4], %s1242_s29, %s1243_s30, %s1244_s4 }
  0x28   : > { %1211 = dma.done.wait [#allocation4], 512 }
  0x29   : > { %1212 = vsyncadd [#allocation4], 4294966784  ;;  %v1350_v0 = vld [vmem:[#allocation2 + $0x10] sm:$0xff]  ;;  %v1352_v1 = vld [vmem:[#allocation2] sm:$0xff]  ;;  %s1245_s7 = smov 91   ;;  %v1246_v4 = vmov 0  }
  0x2a   : > { %424 = vrot.lane.b32.xlu1 %v1350_v0, %s1245_s7  ;;  %420 = vrot.lane.b32.xlu0 %v1352_v1, %s1245_s7  ;;  %v415_v2 = vld [vmem:[#allocation2 + $0x18] sm:$0xff]  ;;  %v413_v3 = vld [vmem:[#allocation2 + $0x8] sm:$0xff]  ;;  %s1247_s28 = smov 92   ;;  %s1248_s5 = smov 108   ;;  %v994_v7 = vcombine.high %v1352_v1, %v1350_v0  ;;  %v993_v8 = vcombine.low %v1352_v1, %v1350_v0  ;;  %vm708_vm0 = vcmask 130048   ;;  %v522_v10 = vld [vmem:[%s1529_s2] sm:$0xff] }
  0x2b   : > { %768 = vmatprep.subr.bf16.mxu1 %v1246_v4  ;;  %1120 = vset.pattern.permute.xlu0 %v1246_v4  ;;  %s1249_s8 = smov 109   ;;  %s1250_s9 = smov 110   ;;  %v194_v5 = vld [vmem:[#allocation2 + $0x8] sm:$0xf]  ;;  %v196_v6 = vld [vmem:[#allocation2 + $0x18] sm:$0xf] }
  0x2c   : > { %1121 = vset.pattern.permute.xlu1 %v1246_v4  ;;  %s1251_s10 = smov 126   ;;  %198 = vst [vmem:[#allocation3 + $0x8] sm:$0xf] %v194_v5  ;;  %200 = vst [vmem:[#allocation3 + $0x14] sm:$0xf] %v196_v6  ;;  %s1252_s11 = smov 127  }
  0x2d   : > { %v1135_v9 = vld [vmem:[%s1528_s1 + $0x4] ss:$8 sps:$4 sm:$0xff]   ;;  %s1253_s21 = smov 90   ;;  %v524_v12 = vld [vmem:[%s1529_s2 + $0x10] sm:$0xff]  ;;  %v525_v13 = vld [vmem:[%s1529_s2 + $0x18] sm:$0xff]  ;;  %vm221_vm1 = vcmask 1043456  }
  0x2e   : > { %426 = vrot.lane.b32.xlu1 %v415_v2, %s1245_s7  ;;  %422 = vrot.lane.b32.xlu0 %v413_v3, %s1245_s7  ;;  %v523_v11 = vld [vmem:[%s1529_s2 + $0x8] sm:$0xff]  ;;  %vm433_vm2 = vcmask 744448   ;;  %vm398_vm3 = vcmask 752640   ;;  %vm363_vm4 = vcmask 883712   ;;  %vm328_vm5 = vcmask 891904   ;;  %s893_s23 = sshll.u32 %s1348_s6, 4  ;;  %s1477_s23 = int_to_ptr.vmem [resolvable:$true] %s893_s23 }
  0x2f   : > { %1022 = vmatprep.mubr.msk.bf16.mxu1 %vm708_vm0, %v1135_v9  ;;  %1020 = vmatprep.mubr.msk.bf16.mxu0 %vm708_vm0, %v1135_v9  ;;  %vm293_vm6 = vcmask 900096   ;;  %vm258_vm7 = vcmask 1031168   ;;  %vm223_vm8 = vcmask 1039360   ;;  %vm468_vm9 = vcmask 736256   ;;  %s1161_s4 = scalar_lea.vmem %s1477_s23, 768  ;;  %s1254_s7 = smov [#allocation5]  }
  0x30   : > { %p1162_p9 = scmp.ne.s32.totalorder %s1477_s23, %s1161_s4 }
  0x32   : > { %387 = vrot.lane.b32.xlu1 %v413_v3, %s1247_s28  ;;  %385 = vrot.lane.b32.xlu0 %v1352_v1, %s1247_s28  ;;  %p1163_p10 = pnand %p1162_p9, %p1317_p4 }
  0x34   : > { %p1164_p11 = pneg %p1163_p10 }
  0x36   : > { %391 = vrot.lane.b32.xlu1 %v415_v2, %s1247_s28  ;;  %389 = vrot.lane.b32.xlu0 %v1350_v0, %s1247_s28  ;;  %s1165_s28 = sshll.u32 %s1254_s7, 4  ;;  %s1166_s28 = int_to_ptr.vmem [resolvable:$false] %s1165_s28 }
  0x37   : > { %p1168_p12 = scmp.lt.s32.totalorder %s1477_s23, %s1166_s28 }
  0x3a   : > { %352 = vrot.lane.b32.xlu1 %v413_v3, %s1248_s5  ;;  %350 = vrot.lane.b32.xlu0 %v1352_v1, %s1248_s5 }
  0x3e   : > { %356 = vrot.lane.b32.xlu1 %v415_v2, %s1248_s5  ;;  %354 = vrot.lane.b32.xlu0 %v1350_v0, %s1248_s5  ;;  %s1167_s5 = scalar_lea.vmem %s1166_s28, 1536 }
  0x3f   : > { %p1169_p13 = scmp.lt.s32.totalorder %s1167_s5, %s1161_s4 }
  0x41   : > { %p1170_p0 = por %p1169_p13, %p1168_p12 }
  0x42   : > { %317 = vrot.lane.b32.xlu1 %v413_v3, %s1249_s8  ;;  %315 = vrot.lane.b32.xlu0 %v1352_v1, %s1249_s8 }
  0x43   : > { %p1171_p1 = pnand %p1170_p0, %p1164_p11 }
  0x46   : > { %321 = vrot.lane.b32.xlu1 %v415_v2, %s1249_s8  ;;  %319 = vrot.lane.b32.xlu0 %v1350_v0, %s1249_s8 }
  0x4a   : > { %282 = vrot.lane.b32.xlu1 %v413_v3, %s1250_s9  ;;  %280 = vrot.lane.b32.xlu0 %v1352_v1, %s1250_s9 }
  0x4e   : > { %286 = vrot.lane.b32.xlu1 %v415_v2, %s1250_s9  ;;  %284 = vrot.lane.b32.xlu0 %v1350_v0, %s1250_s9 }
  0x52   : > { %247 = vrot.lane.b32.xlu1 %v413_v3, %s1251_s10  ;;  %245 = vrot.lane.b32.xlu0 %v1352_v1, %s1251_s10 }
  0x56   : > { %251 = vrot.lane.b32.xlu1 %v415_v2, %s1251_s10  ;;  %249 = vrot.lane.b32.xlu0 %v1350_v0, %s1251_s10 }
  0x5a   : > { %211 = vrot.lane.b32.xlu1 %v413_v3, %s1252_s11  ;;  %209 = vrot.lane.b32.xlu0 %v1352_v1, %s1252_s11 }
  0x5e   : > { %215 = vrot.lane.b32.xlu1 %v415_v2, %s1252_s11  ;;  %213 = vrot.lane.b32.xlu0 %v1350_v0, %s1252_s11 }
  0x62   : > { %457 = vrot.lane.b32.xlu1 %v413_v3, %s1253_s21  ;;  %455 = vrot.lane.b32.xlu0 %v1352_v1, %s1253_s21  ;;  %v1138_v1 = vld [vmem:[%s1528_s1 + $0x10] ss:$8 sps:$4 sm:$0xff]  }
  0x66   : > { %461 = vrot.lane.b32.xlu1 %v415_v2, %s1253_s21  ;;  %459 = vrot.lane.b32.xlu0 %v1350_v0, %s1253_s21  ;;  %s1049_s21 = smul.u32 768, %s1231_s15  ;;  %s1482_s15 = scalar_lea.sflag [#allocation6], %s134_s26 }
  0x68   : > { %s1475_s30 = scalar_lea.hbm %s1530_s3, %s1049_s21 }
  0x6a   : > { %528 = vperm.xlu0 %1120, %v522_v10   ;;  %533 = vperm.xlu1 %1121, %v523_v11  }
  0x6e   : > { %538 = vperm.xlu1 %1121, %v524_v12   ;;  %543 = vperm.xlu0 %1120, %v525_v13  }
  0x9c   : > { %v425_v14 = vpop.permute.xlu1 %424  ;;  %v421_v15 = vpop.permute.xlu0 %420 }
  0x9d   : > { %v428_v16 = vrot.slane %v421_v15, 4  ;;  %v430_v19 = vrot.slane %v425_v14, 4 }
  0xa0   : > { %v427_v17 = vpop.permute.xlu1 %426  ;;  %v423_v18 = vpop.permute.xlu0 %422 }
  0xa1   : > { %v431_v20 = vrot.slane %v427_v17, 4  ;;  %v429_v21 = vrot.slane %v423_v18, 4 }
  0xa3   : > { %v436_v22 = vsel %vm221_vm1, %v430_v19, %v431_v20  ;;  %v438_v23 = vsel %vm433_vm2, %v427_v17, %v431_v20  ;;  %v432_v24 = vsel %vm221_vm1, %v428_v16, %v429_v21  ;;  %v435_v25 = vsel %vm433_vm2, %v423_v18, %v429_v21 }
  0xa4   : > { %v437_v26 = vsel %vm433_vm2, %v425_v14, %v436_v22  ;;  %446 = vst [vmem:[#allocation3 + $0xbc] sm:$0xf] %v438_v23  ;;  %v434_v27 = vsel %vm433_vm2, %v421_v15, %v432_v24  ;;  %444 = vst [vmem:[#allocation3 + $0xb0] sm:$0xf] %v435_v25  ;;  %v388_v28 = vpop.permute.xlu1 %387  ;;  %v386_v29 = vpop.permute.xlu0 %385 }
  0xa5   : > { %v394_v30 = vrot.slane %v388_v28, 4  ;;  %v393_v31 = vrot.slane %v386_v29, 4  ;;  %v1015_v32 = vcombine.high %v434_v27, %v437_v26  ;;  %v1014_v33 = vcombine.low %v434_v27, %v437_v26 }
  0xa7   : > { %v400_v34 = vsel %vm398_vm3, %v388_v28, %v394_v30  ;;  %v397_v35 = vsel %vm221_vm1, %v393_v31, %v394_v30  ;;  %715 = vmatprep.subr.bf16.mxu0 %v1015_v32 }
  0xa8   : > { %409 = vst [vmem:[#allocation3 + $0x98] sm:$0xf] %v400_v34  ;;  %v399_v36 = vsel %vm398_vm3, %v386_v29, %v397_v35  ;;  %v392_v37 = vpop.permute.xlu1 %391  ;;  %v390_v38 = vpop.permute.xlu0 %389  ;;  %716 = vmatpush1.bf16.msra.mxu0 %v1014_v33 }
  0xa9   : > { %v396_v39 = vrot.slane %v392_v37, 4  ;;  %v395_v40 = vrot.slane %v390_v38, 4 }
  0xab   : > { %v403_v41 = vsel %vm398_vm3, %v392_v37, %v396_v39  ;;  %v401_v42 = vsel %vm221_vm1, %v395_v40, %v396_v39  ;;  %v1122_v43 = vld [vmem:[#allocation3 + $0xb0] ss:$12 sps:$4 sm:$0xff]  }
  0xac   : > { %411 = vst [vmem:[#allocation3 + $0xa4] sm:$0xf] %v403_v41  ;;  %v402_v44 = vsel %vm398_vm3, %v390_v38, %v401_v42  ;;  %v353_v45 = vpop.permute.xlu1 %352  ;;  %v351_v46 = vpop.permute.xlu0 %350  ;;  %769 = vmatpush1.bf16.msra.mxu1 %v1122_v43 }
  0xad   : > { %v359_v47 = vrot.slane %v353_v45, 4  ;;  %v358_v48 = vrot.slane %v351_v46, 4  ;;  %v1012_v49 = vcombine.high %v399_v36, %v402_v44  ;;  %v1011_v50 = vcombine.low %v399_v36, %v402_v44  ;;  %770 = vmatprep.subr.bf16.mxu1 %v1246_v4 }
  0xaf   : > { %v365_v51 = vsel %vm363_vm4, %v353_v45, %v359_v47  ;;  %v362_v52 = vsel %vm221_vm1, %v358_v48, %v359_v47  ;;  %717 = vmatprep.subr.bf16.mxu0 %v1012_v49 }
  0xb0   : > { %374 = vst [vmem:[#allocation3 + $0x80] sm:$0xf] %v365_v51  ;;  %v364_v53 = vsel %vm363_vm4, %v351_v46, %v362_v52  ;;  %v357_v54 = vpop.permute.xlu1 %356  ;;  %v355_v55 = vpop.permute.xlu0 %354  ;;  %718 = vmatpush1.bf16.msra.mxu0 %v1011_v50 }
  0xb1   : > { %v361_v56 = vrot.slane %v357_v54, 4  ;;  %v360_v57 = vrot.slane %v355_v55, 4 }
  0xb3   : > { %v368_v58 = vsel %vm363_vm4, %v357_v54, %v361_v56  ;;  %v366_v59 = vsel %vm221_vm1, %v360_v57, %v361_v56  ;;  %v1123_v60 = vld [vmem:[#allocation3 + $0x98] ss:$12 sps:$4 sm:$0xff]  }
  0xb4   : > { %376 = vst [vmem:[#allocation3 + $0x8c] sm:$0xf] %v368_v58  ;;  %v367_v61 = vsel %vm363_vm4, %v355_v55, %v366_v59  ;;  %v318_v62 = vpop.permute.xlu1 %317  ;;  %v316_v63 = vpop.permute.xlu0 %315  ;;  %771 = vmatpush1.bf16.msra.mxu1 %v1123_v60 }
  0xb5   : > { %v324_v2 = vrot.slane %v318_v62, 4  ;;  %v323_v3 = vrot.slane %v316_v63, 4  ;;  %v1009_v5 = vcombine.high %v364_v53, %v367_v61  ;;  %v1008_v6 = vcombine.low %v364_v53, %v367_v61  ;;  %772 = vmatprep.subr.bf16.mxu1 %v1246_v4 }
  0xb7   : > { %v330_v9 = vsel %vm328_vm5, %v318_v62, %v324_v2  ;;  %v327_v10 = vsel %vm221_vm1, %v323_v3, %v324_v2  ;;  %719 = vmatprep.subr.bf16.mxu0 %v1009_v5 }
  0xb8   : > { %339 = vst [vmem:[#allocation3 + $0x68] sm:$0xf] %v330_v9  ;;  %v329_v11 = vsel %vm328_vm5, %v316_v63, %v327_v10  ;;  %v322_v12 = vpop.permute.xlu1 %321  ;;  %v320_v13 = vpop.permute.xlu0 %319  ;;  %720 = vmatpush1.bf16.msra.mxu0 %v1008_v6 }
  0xb9   : > { %v326_v14 = vrot.slane %v322_v12, 4  ;;  %v325_v15 = vrot.slane %v320_v13, 4 }
  0xbb   : > { %v333_v16 = vsel %vm328_vm5, %v322_v12, %v326_v14  ;;  %v331_v17 = vsel %vm221_vm1, %v325_v15, %v326_v14  ;;  %v1124_v18 = vld [vmem:[#allocation3 + $0x80] ss:$12 sps:$4 sm:$0xff]  }
  0xbc   : > { %341 = vst [vmem:[#allocation3 + $0x74] sm:$0xf] %v333_v16  ;;  %v332_v19 = vsel %vm328_vm5, %v320_v13, %v331_v17  ;;  %v283_v20 = vpop.permute.xlu1 %282  ;;  %v281_v21 = vpop.permute.xlu0 %280  ;;  %773 = vmatpush1.bf16.msra.mxu1 %v1124_v18 }
  0xbd   : > { %v289_v22 = vrot.slane %v283_v20, 4  ;;  %v288_v23 = vrot.slane %v281_v21, 4  ;;  %v1006_v24 = vcombine.high %v329_v11, %v332_v19  ;;  %v1005_v25 = vcombine.low %v329_v11, %v332_v19  ;;  %774 = vmatprep.subr.bf16.mxu1 %v1246_v4 }
  0xbf   : > { %v295_v26 = vsel %vm293_vm6, %v283_v20, %v289_v22  ;;  %v292_v27 = vsel %vm221_vm1, %v288_v23, %v289_v22  ;;  %721 = vmatprep.subr.bf16.mxu0 %v1006_v24 }
  0xc0   : > { %304 = vst [vmem:[#allocation3 + $0x50] sm:$0xf] %v295_v26  ;;  %v294_v28 = vsel %vm293_vm6, %v281_v21, %v292_v27  ;;  %v287_v29 = vpop.permute.xlu1 %286  ;;  %v285_v30 = vpop.permute.xlu0 %284  ;;  %722 = vmatpush1.bf16.msra.mxu0 %v1005_v25 }
  0xc1   : > { %v291_v31 = vrot.slane %v287_v29, 4  ;;  %v290_v32 = vrot.slane %v285_v30, 4 }
  0xc3   : > { %v298_v33 = vsel %vm293_vm6, %v287_v29, %v291_v31  ;;  %v296_v34 = vsel %vm221_vm1, %v290_v32, %v291_v31  ;;  %v1125_v35 = vld [vmem:[#allocation3 + $0x68] ss:$12 sps:$4 sm:$0xff]  }
  0xc4   : > { %306 = vst [vmem:[#allocation3 + $0x5c] sm:$0xf] %v298_v33  ;;  %v297_v36 = vsel %vm293_vm6, %v285_v30, %v296_v34  ;;  %v248_v37 = vpop.permute.xlu1 %247  ;;  %v246_v38 = vpop.permute.xlu0 %245  ;;  %775 = vmatpush1.bf16.msra.mxu1 %v1125_v35  ;;  %v1129_v29 = vld [vmem:[#allocation3 + $0x8] ss:$12 sps:$4 sm:$0xff]  }
  0xc5   : > { %v254_v39 = vrot.slane %v248_v37, 4  ;;  %v253_v40 = vrot.slane %v246_v38, 4  ;;  %v1003_v41 = vcombine.high %v294_v28, %v297_v36  ;;  %v1002_v42 = vcombine.low %v294_v28, %v297_v36  ;;  %776 = vmatprep.subr.bf16.mxu1 %v1246_v4  ;;  %v1136_v32 = vld [vmem:[%s1528_s1 + $0x14] ss:$8 sps:$4 sm:$0xff]  }
  0xc7   : > { %v260_v43 = vsel %vm258_vm7, %v248_v37, %v254_v39  ;;  %v257_v44 = vsel %vm221_vm1, %v253_v40, %v254_v39  ;;  %723 = vmatprep.subr.bf16.mxu0 %v1003_v41 }
  0xc8   : > { %269 = vst [vmem:[#allocation3 + $0x38] sm:$0xf] %v260_v43  ;;  %v259_v45 = vsel %vm258_vm7, %v246_v38, %v257_v44  ;;  %v252_v46 = vpop.permute.xlu1 %251  ;;  %v250_v47 = vpop.permute.xlu0 %249  ;;  %724 = vmatpush1.bf16.msra.mxu0 %v1002_v42 }
  0xc9   : > { %v256_v48 = vrot.slane %v252_v46, 4  ;;  %v255_v49 = vrot.slane %v250_v47, 4 }
  0xcb   : > { %v263_v50 = vsel %vm258_vm7, %v252_v46, %v256_v48  ;;  %v261_v51 = vsel %vm221_vm1, %v255_v49, %v256_v48  ;;  %v1126_v52 = vld [vmem:[#allocation3 + $0x50] ss:$12 sps:$4 sm:$0xff]  }
  0xcc   : > { %271 = vst [vmem:[#allocation3 + $0x44] sm:$0xf] %v263_v50  ;;  %v262_v53 = vsel %vm258_vm7, %v250_v47, %v261_v51  ;;  %v212_v54 = vpop.permute.xlu1 %211  ;;  %v210_v55 = vpop.permute.xlu0 %209  ;;  %777 = vmatpush1.bf16.msra.mxu1 %v1126_v52 }
  0xcd   : > { %v218_v56 = vrot.slane %v212_v54, 4  ;;  %v217_v57 = vrot.slane %v210_v55, 4  ;;  %v1000_v58 = vcombine.high %v259_v45, %v262_v53  ;;  %v999_v59 = vcombine.low %v259_v45, %v262_v53  ;;  %778 = vmatprep.subr.bf16.mxu1 %v1246_v4 }
  0xcf   : > { %v225_v60 = vsel %vm223_vm8, %v212_v54, %v218_v56  ;;  %v222_v61 = vsel %vm221_vm1, %v217_v57, %v218_v56  ;;  %725 = vmatprep.subr.bf16.mxu0 %v1000_v58 }
  0xd0   : > { %234 = vst [vmem:[#allocation3 + $0x20] sm:$0xf] %v225_v60  ;;  %v224_v62 = vsel %vm223_vm8, %v210_v55, %v222_v61  ;;  %v216_v63 = vpop.permute.xlu1 %215  ;;  %v214_v2 = vpop.permute.xlu0 %213  ;;  %726 = vmatpush1.bf16.msra.mxu0 %v999_v59 }
  0xd1   : > { %v220_v3 = vrot.slane %v216_v63, 4  ;;  %v219_v5 = vrot.slane %v214_v2, 4 }
  0xd3   : > { %v228_v6 = vsel %vm223_vm8, %v216_v63, %v220_v3  ;;  %v226_v9 = vsel %vm221_vm1, %v219_v5, %v220_v3  ;;  %v1127_v10 = vld [vmem:[#allocation3 + $0x38] ss:$12 sps:$4 sm:$0xff]  }
  0xd4   : > { %236 = vst [vmem:[#allocation3 + $0x2c] sm:$0xf] %v228_v6  ;;  %v227_v11 = vsel %vm223_vm8, %v214_v2, %v226_v9  ;;  %v458_v12 = vpop.permute.xlu1 %457  ;;  %v456_v13 = vpop.permute.xlu0 %455  ;;  %779 = vmatpush1.bf16.msra.mxu1 %v1127_v10 }
  0xd5   : > { %v464_v14 = vrot.slane %v458_v12, 4  ;;  %v463_v15 = vrot.slane %v456_v13, 4  ;;  %v997_v16 = vcombine.high %v224_v62, %v227_v11  ;;  %v996_v17 = vcombine.low %v224_v62, %v227_v11  ;;  %780 = vmatprep.subr.bf16.mxu1 %v1246_v4 }
  0xd7   : > { %v470_v18 = vsel %vm468_vm9, %v458_v12, %v464_v14  ;;  %v467_v19 = vsel %vm221_vm1, %v463_v15, %v464_v14  ;;  %727 = vmatprep.subr.bf16.mxu0 %v997_v16 }
  0xd8   : > { %479 = vst [vmem:[#allocation3 + $0xc8] sm:$0xf] %v470_v18  ;;  %v469_v20 = vsel %vm468_vm9, %v456_v13, %v467_v19  ;;  %v462_v21 = vpop.permute.xlu1 %461  ;;  %v460_v22 = vpop.permute.xlu0 %459  ;;  %728 = vmatpush1.bf16.msra.mxu0 %v996_v17 }
  0xd9   : > { %v466_v23 = vrot.slane %v462_v21, 4  ;;  %v465_v24 = vrot.slane %v460_v22, 4  ;;  %729 = vmatprep.subr.bf16.mxu0 %v994_v7  ;;  %v1133_v7 = vld [vmem:[%s1528_s1] ss:$8 sps:$4 sm:$0xff]  }
  0xdb   : > { %v473_v25 = vsel %vm468_vm9, %v462_v21, %v466_v23  ;;  %v471_v26 = vsel %vm221_vm1, %v465_v24, %v466_v23  ;;  %v1128_v27 = vld [vmem:[#allocation3 + $0x20] ss:$12 sps:$4 sm:$0xff]  }
  0xdc   : > { %481 = vst [vmem:[#allocation3 + $0xd4] sm:$0xf] %v473_v25  ;;  %v472_v28 = vsel %vm468_vm9, %v460_v22, %v471_v26  ;;  %730 = vmatpush1.bf16.msra.mxu0 %v993_v8  ;;  %781 = vmatpush1.bf16.msra.mxu1 %v1128_v27 }
  0xdd   : > { %v1018_v30 = vcombine.high %v469_v20, %v472_v28  ;;  %v1017_v31 = vcombine.low %v469_v20, %v472_v28  ;;  %782 = vmatprep.subr.bf16.mxu1 %v1246_v4 }
  0xdf   : > { %745 = vmatprep.subr.bf16.mxu0 %v1018_v30 }
  0xe0   : > { %746 = vmatpush2.bf16.msra.mxu0 %v1017_v31  ;;  %783 = vmatpush1.bf16.msra.mxu1 %v1129_v29 }
  0xe1   : > { %798 = vmatprep.subr.bf16.mxu1 %v1246_v4 }
  0xe3   : > { %v1132_v0 = vld [vmem:[#allocation3 + $0xc8] ss:$12 sps:$4 sm:$0xff]   ;;  %748 = vmatmul.mubr.bf16.vlgmr.msra.gmra.mxu0 %v1133_v7 }
  0xe4   : > { %1021 = vmatprep.mubr.msk.bf16.mxu0 %vm708_vm0, %v1136_v32  ;;  %799 = vmatpush2.bf16.msra.mxu1 %v1132_v0 }
  0xe5   : > { %v529_v8 = vpop.permute.xlu0 %528  ;;  %v534_v35 = vpop.permute.xlu1 %533 }
  0xe7   : > { %801 = vmatmul.mubr.bf16.vlgmr.msra.gmra.mxu1 %v1133_v7 }
  0xe8   : > { %1023 = vmatprep.mubr.msk.bf16.mxu1 %vm708_vm0, %v1136_v32 }
  0xe9   : > { %v539_v44 = vpop.permute.xlu1 %538  ;;  %v544_v56 = vpop.permute.xlu0 %543 }
  0xeb   : > { %758 = vmatmul.mubr.bf16.gmra.mxu0 %v1138_v1 }
  0xef   : > { %809 = vmatmul.mubr.bf16.gmra.mxu1 %v1138_v1 }
 0x1a3   : > { %v749_v33 = vpop.f32.mrf.mxu0 }
 0x1a4   : > { %v750_v34 = vadd.f32 %v749_v33, %v529_v8 }
 0x1a5   : > { %v751_v4 = vpop.f32.mrf.mxu0 }
 0x1a6   : > { %v817_v36 = vmax.f32 %v750_v34, 0.0  ;;  %v752_v37 = vadd.f32 %v751_v4, %v529_v8 }
 0x1a7   : > { %v753_v38 = vpop.f32.mrf.mxu0  ;;  %v802_v39 = vpop.f32.mrf.mxu1 }
 0x1a8   : > { %v818_v40 = vmax.f32 %v752_v37, 0.0  ;;  %v754_v41 = vadd.f32 %v753_v38, %v534_v35  ;;  %v803_v42 = vadd.f32 %v802_v39, %v529_v8 }
 0x1a9   : > { %v755_v43 = vpop.f32.mrf.mxu0  ;;  %v804_v45 = vpop.f32.mrf.mxu1 }
 0x1aa   : > { %v1040_v46 = vpack.c.bf16 %v818_v40, %v817_v36  ;;  %v756_v47 = vadd.f32 %v755_v43, %v534_v35  ;;  %v819_v48 = vmax.f32 %v803_v42, 0.0  ;;  %v820_v51 = vmax.f32 %v754_v41, 0.0 }
 0x1ab   : > { %v759_v49 = vpop.f32.mrf.mxu0  ;;  %v805_v50 = vpop.f32.mrf.mxu1 }
 0x1ac   : > { %869 = vst [vmem:[%s1348_s6] sm:$0xff] %v1040_v46  ;;  %v821_v52 = vmax.f32 %v756_v47, 0.0  ;;  %v760_v53 = vadd.f32 %v759_v49, %v539_v44  ;;  %v1041_v54 = vpack.c.bf16 %v819_v48, %v819_v48  ;;  %v806_v55 = vadd.f32 %v805_v50, %v534_v35 }
 0x1ad   : > { %v761_v57 = vpop.f32.mrf.mxu0  ;;  %v807_v58 = vpop.f32.mrf.mxu1 }
 0x1ae   : > { %v1042_v59 = vpack.c.bf16 %v821_v52, %v820_v51  ;;  %v823_v60 = vmax.f32 %v760_v53, 0.0  ;;  %v762_v61 = vadd.f32 %v761_v57, %v539_v44  ;;  %870 = vst [vmem:[%s1348_s6 + $0x8] sm:$0xf] %v1041_v54  ;;  %v822_v62 = vmax.f32 %v806_v55, 0.0 }
 0x1af   : > { %v763_v63 = vpop.f32.mrf.mxu0  ;;  %v810_v2 = vpop.f32.mrf.mxu1 }
 0x1b0   : > { %871 = vst [vmem:[%s1348_s6 + $0xc] sm:$0xff] %v1042_v59  ;;  %v824_v3 = vmax.f32 %v762_v61, 0.0  ;;  %v764_v5 = vadd.f32 %v763_v63, %v544_v56  ;;  %v1043_v6 = vpack.c.bf16 %v822_v62, %v822_v62  ;;  %v811_v9 = vadd.f32 %v810_v2, %v539_v44 }
 0x1b1   : > { %v765_v10 = vpop.f32.mrf.mxu0  ;;  %v812_v11 = vpop.f32.mrf.mxu1 }
 0x1b2   : > { %v1044_v12 = vpack.c.bf16 %v824_v3, %v823_v60  ;;  %v766_v13 = vadd.f32 %v765_v10, %v544_v56  ;;  %872 = vst [vmem:[%s1348_s6 + $0x14] sm:$0xf] %v1043_v6  ;;  %v825_v14 = vmax.f32 %v811_v9, 0.0  ;;  %v826_v16 = vmax.f32 %v764_v5, 0.0 }
 0x1b3   : > { %v813_v15 = vpop.f32.mrf.mxu1 }
 0x1b4   : > { %873 = vst [vmem:[%s1348_s6 + $0x18] sm:$0xff] %v1044_v12  ;;  %v827_v17 = vmax.f32 %v766_v13, 0.0  ;;  %v1045_v18 = vpack.c.bf16 %v825_v14, %v825_v14  ;;  %v814_v19 = vadd.f32 %v813_v15, %v544_v56 }
 0x1b5   : > { %v815_v20 = vpop.f32.mrf.mxu1 }
 0x1b6   : > { %v1046_v21 = vpack.c.bf16 %v827_v17, %v826_v16  ;;  %874 = vst [vmem:[%s1348_s6 + $0x20] sm:$0xf] %v1045_v18  ;;  %v828_v22 = vmax.f32 %v814_v19, 0.0 }
 0x1b8   : > { %875 = vst [vmem:[%s1348_s6 + $0x24] sm:$0xff] %v1046_v21  ;;  %v1047_v23 = vpack.c.bf16 %v828_v22, %v828_v22 }
 0x1ba   : > { %876 = vst [vmem:[%s1348_s6 + $0x2c] sm:$0xf] %v1047_v23 }
 0x1bb   : > { %1174 = shalt.err (!%p1171_p1)
}
 0x1bc   : > { %s1175_s26 = scalar_lea.hbm %s1475_s30, 768  ;;  %s1179_s9 = scalar_lea.hbm %s1530_s3, 1536 }
 0x1bd   : > { %p1176_p2 = scmp.ne.s32.totalorder %s1475_s30, %s1175_s26  ;;  %p1180_p6 = scmp.lt.s32.totalorder %s1475_s30, %s1530_s3 }
 0x1be   : > { %p1181_p7 = scmp.lt.s32.totalorder %s1179_s9, %s1175_s26 }
 0x1bf   : > { %p1177_p3 = pnand %p1176_p2, %p1317_p4 }
 0x1c0   : > { %p1182_p9 = por %p1181_p7, %p1180_p6 }
 0x1c1   : > { %p1178_p5 = pneg %p1177_p3 }
 0x1c3   : > { %p1183_p10 = pnand %p1182_p9, %p1178_p5 }
 0x1c5   : > { %1186 = shalt.err (!%p1183_p10)
}
 0x1c6   : > { %s1255_s18 = smov 192   ;;  %s1256_s19 = smov 12  }
 0x1c7   : > { %1050 = dma.vmem_to_hbm [thread:$0]  (%p1317_p4), %s1477_s23, 768, %s1475_s30, %s1482_s15, %s1255_s18, %s1255_s18, %s1256_s19  }
 0x1c8 PF: > { %p1056_p11 = scmp.ge.s32.totalorder %s1239_s17, 2  ;;  %s908_s21 = sand.u32 1, %s1219_s12  }
 0x1c9   : > { %s909_s27 = scalar_lea.sflag [#allocation6], %s908_s21 }
 0x1ca   : > { %p1053_p12 = pnand %p1056_p11, %p1324_p8 }
 0x1cc   : > { %p1054_p13 = pneg %p1053_p12 }
 0x1ce   : > { %1214 = dma.done.wait (%p1054_p13), %s909_s27, 768  }
 0x1cf   : > { %1216 = vsyncadd (%p1054_p13), %s909_s27, 4294966528  ;;  %s16_s17 = sadd.s32 1, %s1239_s17   ;;  %s1533_s12 = smov %s1223_s13 }
 0x1d0   : > { %p13_p0 = scmp.ge.s32.totalorder %s16_s17, 4   ;;  %s1534_s13 = smov %s1227_s14 }
 0x1d1   : > { %s1535_s14 = smov %s1330_s25  ;;  %s1536_s15 = smov %s1235_s16 }
 0x1d2   : > { %s1537_s16 = smov %s1539_s20  ;;  %15 = sbr.rel (!%p13_p0) target bundleno = 4 (0x4), region = 75 }
 0x1d7   :  { %914 = vsyncpa [#allocation6], 1 }
 0x1d8   :  { %916 = vsyncpa [#allocation6 + $0x1], 1 }
 0x1d9   :  { %917 = vsyncmov [#allocation4] }
 0x1dc   :  { %s918_s22 = vpop.sfrf %917 }
 0x1dd   :  { %p1035_p4 = scmp.ne.s32.totalorder %s918_s22, 0 }
 0x1df   :  { %922 = shalt.err (%p1035_p4)  }
 0x1e0   :  { %924 = vsyncmov [#allocation4 + $0x1] }
 0x1e3   :  { %s925_s24 = vpop.sfrf %924 }
 0x1e4   :  { %p1036_p8 = scmp.ne.s32.totalorder %s925_s24, 0 }
 0x1e6   :  { %929 = shalt.err (%p1036_p8)  }

</bundles_post_ra>
